<compile_context>
chip_gen: v7x
topology: tpu7x:2x2x1
jax: 0.10.0
libtpu: 0.0.40
codegen_flags: <defaults>
</compile_context>

<pallas_src>
import functools

import jax
import jax.numpy as jnp
from jax.experimental import pallas as pl
from jax.experimental.pallas import tpu as pltpu

LEAKY_SLOPE = 0.01   # F.leaky_relu default negative_slope
BN_EPS = 1e-5        # nn.BatchNorm1d default eps


def _leaky_relu(x):
    return jnp.where(x >= 0, x, LEAKY_SLOPE * x)


# ----------------------------------------------------------------------------
# Kernel
# ----------------------------------------------------------------------------
def sae_block_kernel(
    x_ref,                      # (TB, rna_dim + prot_dim)   host-concat input
    w_sae_ref, b_sae_ref,       # block-diag fused SAE Linear
    w1_ref, b1_ref, t1_ref,     # DenseWrapper 1 (BN folded: w*s, b*s, +t)
    w2_ref, b2_ref, t2_ref,     # DenseWrapper 2 (BN folded)
    out_ref,                    # (TB, n_out)
    *, two_class,
):
    # Fused SAE encoders: one MXU matmul == [rna@w_rna | prot@w_prot], then
    # elementwise leaky_relu.  Equivalent to torch.cat((out1, out2), 1).
    combined = _leaky_relu(
        jnp.dot(x_ref[...], w_sae_ref[...], preferred_element_type=jnp.float32)
        + b_sae_ref[...]
    )

    # DenseWrapper 1: Linear -> leaky_relu -> BN(folded) -> dropout(identity)
    h = _leaky_relu(
        jnp.dot(combined, w1_ref[...], preferred_element_type=jnp.float32)
        + b1_ref[...]
    ) + t1_ref[...]

    # DenseWrapper 2
    z = _leaky_relu(
        jnp.dot(h, w2_ref[...], preferred_element_type=jnp.float32)
        + b2_ref[...]
    ) + t2_ref[...]

    if two_class:
        # softmax over exactly 2 classes == sigmoid of the lane difference:
        # avoids cross-lane max/sum reductions and the divide.
        d = z[:, 0:1] - z[:, 1:2]
        p0 = jax.nn.sigmoid(d)
        out_ref[:, 0:1] = p0
        out_ref[:, 1:2] = 1.0 - p0
    else:
        mx = jnp.max(z, axis=-1, keepdims=True)
        e = jnp.exp(z - mx)
        out_ref[...] = e / jnp.sum(e, axis=-1, keepdims=True)


# ----------------------------------------------------------------------------
# Host-side parameter preparation (inference-time constant folding)
# ----------------------------------------------------------------------------
def prepare_inference_params(p):
    """Fuse the two SAE Linears into one block-diagonal Linear and fold
    BatchNorm1d (inference) into the DenseWrapper Linears."""
    rna_dim, lat_r = p["w_rna"].shape
    prot_dim, lat_p = p["w_prot"].shape

    w_sae = jnp.zeros((rna_dim + prot_dim, lat_r + lat_p), jnp.float32)
    w_sae = w_sae.at[:rna_dim, :lat_r].set(p["w_rna"])
    w_sae = w_sae.at[rna_dim:, lat_r:].set(p["w_prot"])
    b_sae = jnp.concatenate([p["b_rna"], p["b_prot"]], axis=1)

    def fold(w, b, g, be, m, v):
        s = g * jax.lax.rsqrt(v + BN_EPS)        # (1, out) per-channel scale
        # leaky_relu(a) * s == leaky_relu(a * s) requires s > 0 per channel.
        assert bool(jnp.all(s > 0)), "BN fold through leaky_relu needs positive scale"
        t = be - m * s                           # additive shift after activation
        return w * s, b * s, t

    w1f, b1f, t1 = fold(p["w1"], p["b1"], p["g1"], p["be1"], p["m1"], p["v1"])
    w2f, b2f, t2 = fold(p["w2"], p["b2"], p["g2"], p["be2"], p["m2"], p["v2"])
    return dict(w_sae=w_sae, b_sae=b_sae,
                w1f=w1f, b1f=b1f, t1=t1,
                w2f=w2f, b2f=b2f, t2=t2)


# ----------------------------------------------------------------------------
# Wrapper
# ----------------------------------------------------------------------------
def sae_block_forward(rna, protein, fp, *, batch_tile=1024):
    """fp = prepare_inference_params(params).  Weights stay resident across a
    (parallel) batch grid; only activation tiles stream."""
    x = jnp.concatenate([rna, protein], axis=1)     # host-side concat (free)
    batch, in_dim = x.shape
    n_out = fp["w2f"].shape[1]

    tb = batch if batch <= batch_tile else batch_tile   # tile is a multiple of 8 at scale
    padded = pl.cdiv(batch, tb) * tb
    if padded != batch:
        x = jnp.pad(x, ((0, padded - batch), (0, 0)))
    grid = (padded // tb,)

    weights = [fp["w_sae"], fp["b_sae"],
               fp["w1f"], fp["b1f"], fp["t1"],
               fp["w2f"], fp["b2f"], fp["t2"]]

    act_spec = pl.BlockSpec((tb, in_dim), lambda i: (i, 0))
    out_spec = pl.BlockSpec((tb, n_out), lambda i: (i, 0))
    const_specs = [pl.BlockSpec(a.shape, lambda i: (0, 0)) for a in weights]

    out = pl.pallas_call(
        functools.partial(sae_block_kernel, two_class=(n_out == 2)),
        out_shape=jax.ShapeDtypeStruct((padded, n_out), jnp.float32),
        grid=grid,
        in_specs=[act_spec] + const_specs,
        out_specs=out_spec,
        compiler_params=pltpu.CompilerParams(
            dimension_semantics=("parallel",)),
    )(x, *weights)
    return out[:batch]


# ----------------------------------------------------------------------------
# Synthetic parameters (PyTorch-equivalent layout) and pure-JAX reference
# ----------------------------------------------------------------------------
def make_params(key, rna_dim, prot_dim, sae_latent, layer_sizes):
    ks = jax.random.split(key, 4)

    def lin(k, fin, fout):
        scale = 1.0 / jnp.sqrt(jnp.float32(fin))
        w = jax.random.uniform(k, (fin, fout), jnp.float32, -scale, scale)
        b = jax.random.uniform(jax.random.fold_in(k, 1), (1, fout),
                               jnp.float32, -scale, scale)
        return w, b

    p = {}
    p["w_rna"], p["b_rna"] = lin(ks[0], rna_dim, sae_latent)
    p["w_prot"], p["b_prot"] = lin(ks[1], prot_dim, sae_latent)

    h0, h1, h2 = layer_sizes  # [128, 64, 2]
    p["w1"], p["b1"] = lin(ks[2], h0, h1)
    p["w2"], p["b2"] = lin(ks[3], h1, h2)
    # BatchNorm1d: gamma=1, beta=0, running mean=0, var=1 (fresh module)
    for i, hdim in ((1, h1), (2, h2)):
        p[f"g{i}"] = jnp.ones((1, hdim), jnp.float32)
        p[f"be{i}"] = jnp.zeros((1, hdim), jnp.float32)
        p[f"m{i}"] = jnp.zeros((1, hdim), jnp.float32)
        p[f"v{i}"] = jnp.ones((1, hdim), jnp.float32)
    return p


def reference_forward(rna, protein, p):
    """Unfused, unfolded pure-JAX reference of the original module semantics."""
    dot = functools.partial(jnp.dot, precision=jax.lax.Precision.HIGHEST)
    out1 = _leaky_relu(dot(rna, p["w_rna"]) + p["b_rna"])
    out2 = _leaky_relu(dot(protein, p["w_prot"]) + p["b_prot"])
    x = jnp.concatenate([out1, out2], axis=1)

    def dense(x, w, b, g, be, m, v):
        h = _leaky_relu(dot(x, w) + b)
        return (h - m) * jax.lax.rsqrt(v + BN_EPS) * g + be

    h = dense(x, p["w1"], p["b1"], p["g1"], p["be1"], p["m1"], p["v1"])
    z = dense(h, p["w2"], p["b2"], p["g2"], p["be2"], p["m2"], p["v2"])
    return jax.nn.softmax(z, axis=1)


if __name__ == "__main__":
    BATCH = 8
    RNA_DIM = 32
    PROT_DIM = 32
    SAE_LATENT = 64                 # 64 + 64 = 128 = layers[0]
    LAYER_SIZES = [128, 64, 2]      # SAEBlock default `layers`

    key = jax.random.PRNGKey(0)
    k_rna, k_prot, k_params = jax.random.split(key, 3)

    rna = jax.random.normal(k_rna, (BATCH, RNA_DIM), jnp.float32)
    protein = jax.random.normal(k_prot, (BATCH, PROT_DIM), jnp.float32)
    params = make_params(k_params, RNA_DIM, PROT_DIM, SAE_LATENT, LAYER_SIZES)
    folded = prepare_inference_params(params)

    out = sae_block_forward(rna, protein, folded)
    out = jax.block_until_ready(out)

    assert out.shape == (BATCH, LAYER_SIZES[-1])
    # softmax rows must sum to 1
    assert bool(jnp.allclose(jnp.sum(out, axis=1), 1.0, atol=1e-5))
    # matches the unfused/unfolded reference
    ref = reference_forward(rna, protein, params)
    assert bool(jnp.allclose(out, ref, atol=5e-3)), "mismatch vs reference"
    print("KERNEL_OK")
</pallas_src>

<mosaic_0001>
module attributes {stable_mosaic.version = 11 : i64} {
  func.func @sae_block_kernel(%arg0: i32, %arg1: memref<8x64xf32, #tpu.memory_space<vmem>>, %arg2: memref<64x128xf32, #tpu.memory_space<vmem>>, %arg3: memref<1x128xf32, #tpu.memory_space<vmem>>, %arg4: memref<128x64xf32, #tpu.memory_space<vmem>>, %arg5: memref<1x64xf32, #tpu.memory_space<vmem>>, %arg6: memref<1x64xf32, #tpu.memory_space<vmem>>, %arg7: memref<64x2xf32, #tpu.memory_space<vmem>>, %arg8: memref<1x2xf32, #tpu.memory_space<vmem>>, %arg9: memref<1x2xf32, #tpu.memory_space<vmem>>, %arg10: memref<8x2xf32, #tpu.memory_space<vmem>>) attributes {dimension_semantics = [#tpu.dimension_semantics<parallel>], iteration_bounds = array<i64: 1>, scalar_prefetch = 0 : i64, scratch_operands = 0 : i64, tpu.core_type = #tpu.core_type<tc>, window_params = [{transform_indices = @transform_0, window_bounds = array<i64: 8, 64>}, {pipeline_mode = #tpu.pipeline_mode<synchronous>, transform_indices = @transform_1, window_bounds = array<i64: 64, 128>}, {pipeline_mode = #tpu.pipeline_mode<synchronous>, transform_indices = @transform_2, window_bounds = array<i64: 1, 128>}, {pipeline_mode = #tpu.pipeline_mode<synchronous>, transform_indices = @transform_3, window_bounds = array<i64: 128, 64>}, {pipeline_mode = #tpu.pipeline_mode<synchronous>, transform_indices = @transform_4, window_bounds = array<i64: 1, 64>}, {pipeline_mode = #tpu.pipeline_mode<synchronous>, transform_indices = @transform_5, window_bounds = array<i64: 1, 64>}, {pipeline_mode = #tpu.pipeline_mode<synchronous>, transform_indices = @transform_6, window_bounds = array<i64: 64, 2>}, {pipeline_mode = #tpu.pipeline_mode<synchronous>, transform_indices = @transform_7, window_bounds = array<i64: 1, 2>}, {pipeline_mode = #tpu.pipeline_mode<synchronous>, transform_indices = @transform_8, window_bounds = array<i64: 1, 2>}, {transform_indices = @transform_9, window_bounds = array<i64: 8, 2>}]} {
    %c0 = arith.constant 0 : index
    %c0_0 = arith.constant 0 : index
    %0 = vector.load %arg1[%c0, %c0_0] : memref<8x64xf32, #tpu.memory_space<vmem>>, vector<8x64xf32>
    %c0_1 = arith.constant 0 : index
    %c0_2 = arith.constant 0 : index
    %1 = vector.load %arg2[%c0_1, %c0_2] : memref<64x128xf32, #tpu.memory_space<vmem>>, vector<64x128xf32>
    %cst = arith.constant dense<0.000000e+00> : vector<8x128xf32>
    %2 = tpu.matmul %0, %1, %cst {dimension_numbers = #tpu.dot_dimension_numbers<[1], [0], [0], [1], [0, 0, 1, 1], [], []>} : vector<8x64xf32>, vector<64x128xf32>, vector<8x128xf32> -> vector<8x128xf32>
    %c0_3 = arith.constant 0 : index
    %c0_4 = arith.constant 0 : index
    %3 = vector.load %arg3[%c0_3, %c0_4] : memref<1x128xf32, #tpu.memory_space<vmem>>, vector<1x128xf32>
    %4 = vector.broadcast %3 : vector<1x128xf32> to vector<8x128xf32>
    %5 = arith.addf %2, %4 : vector<8x128xf32>
    %cst_5 = arith.constant 0.000000e+00 : f32
    %6 = vector.broadcast %cst_5 : f32 to vector<8x128xf32>
    %7 = arith.cmpf oge, %5, %6 : vector<8x128xf32>
    %cst_6 = arith.constant 0.00999999977 : f32
    %8 = vector.broadcast %cst_6 : f32 to vector<8x128xf32>
    %9 = arith.mulf %8, %5 : vector<8x128xf32>
    %10 = arith.select %7, %5, %9 : vector<8x128xi1>, vector<8x128xf32>
    %c0_7 = arith.constant 0 : index
    %c0_8 = arith.constant 0 : index
    %11 = vector.load %arg4[%c0_7, %c0_8] : memref<128x64xf32, #tpu.memory_space<vmem>>, vector<128x64xf32>
    %cst_9 = arith.constant dense<0.000000e+00> : vector<8x64xf32>
    %12 = tpu.matmul %10, %11, %cst_9 {dimension_numbers = #tpu.dot_dimension_numbers<[1], [0], [0], [1], [0, 0, 1, 1], [], []>} : vector<8x128xf32>, vector<128x64xf32>, vector<8x64xf32> -> vector<8x64xf32>
    %c0_10 = arith.constant 0 : index
    %c0_11 = arith.constant 0 : index
    %13 = vector.load %arg5[%c0_10, %c0_11] : memref<1x64xf32, #tpu.memory_space<vmem>>, vector<1x64xf32>
    %14 = vector.broadcast %13 : vector<1x64xf32> to vector<8x64xf32>
    %15 = arith.addf %12, %14 : vector<8x64xf32>
    %cst_12 = arith.constant 0.000000e+00 : f32
    %16 = vector.broadcast %cst_12 : f32 to vector<8x64xf32>
    %17 = arith.cmpf oge, %15, %16 : vector<8x64xf32>
    %cst_13 = arith.constant 0.00999999977 : f32
    %18 = vector.broadcast %cst_13 : f32 to vector<8x64xf32>
    %19 = arith.mulf %18, %15 : vector<8x64xf32>
    %20 = arith.select %17, %15, %19 : vector<8x64xi1>, vector<8x64xf32>
    %c0_14 = arith.constant 0 : index
    %c0_15 = arith.constant 0 : index
    %21 = vector.load %arg6[%c0_14, %c0_15] : memref<1x64xf32, #tpu.memory_space<vmem>>, vector<1x64xf32>
    %22 = vector.broadcast %21 : vector<1x64xf32> to vector<8x64xf32>
    %23 = arith.addf %20, %22 : vector<8x64xf32>
    %c0_16 = arith.constant 0 : index
    %c0_17 = arith.constant 0 : index
    %24 = vector.load %arg7[%c0_16, %c0_17] : memref<64x2xf32, #tpu.memory_space<vmem>>, vector<64x2xf32>
    %cst_18 = arith.constant dense<0.000000e+00> : vector<8x2xf32>
    %25 = tpu.matmul %23, %24, %cst_18 {dimension_numbers = #tpu.dot_dimension_numbers<[1], [0], [0], [1], [0, 0, 1, 1], [], []>} : vector<8x64xf32>, vector<64x2xf32>, vector<8x2xf32> -> vector<8x2xf32>
    %c0_19 = arith.constant 0 : index
    %c0_20 = arith.constant 0 : index
    %26 = vector.load %arg8[%c0_19, %c0_20] : memref<1x2xf32, #tpu.memory_space<vmem>>, vector<1x2xf32>
    %27 = vector.broadcast %26 : vector<1x2xf32> to vector<8x2xf32>
    %28 = arith.addf %25, %27 : vector<8x2xf32>
    %cst_21 = arith.constant 0.000000e+00 : f32
    %29 = vector.broadcast %cst_21 : f32 to vector<8x2xf32>
    %30 = arith.cmpf oge, %28, %29 : vector<8x2xf32>
    %cst_22 = arith.constant 0.00999999977 : f32
    %31 = vector.broadcast %cst_22 : f32 to vector<8x2xf32>
    %32 = arith.mulf %31, %28 : vector<8x2xf32>
    %33 = arith.select %30, %28, %32 : vector<8x2xi1>, vector<8x2xf32>
    %c0_23 = arith.constant 0 : index
    %c0_24 = arith.constant 0 : index
    %34 = vector.load %arg9[%c0_23, %c0_24] : memref<1x2xf32, #tpu.memory_space<vmem>>, vector<1x2xf32>
    %35 = vector.broadcast %34 : vector<1x2xf32> to vector<8x2xf32>
    %36 = arith.addf %33, %35 : vector<8x2xf32>
    %37 = vector.extract_strided_slice %36 {offsets = [0, 0], sizes = [8, 1], strides = [1, 1]} : vector<8x2xf32> to vector<8x1xf32>
    %38 = vector.extract_strided_slice %36 {offsets = [0, 1], sizes = [8, 1], strides = [1, 1]} : vector<8x2xf32> to vector<8x1xf32>
    %39 = arith.subf %37, %38 : vector<8x1xf32>
    %40 = arith.negf %39 : vector<8x1xf32>
    %41 = math.exp %40 : vector<8x1xf32>
    %cst_25 = arith.constant 1.000000e+00 : f32
    %42 = vector.broadcast %cst_25 : f32 to vector<8x1xf32>
    %43 = arith.addf %42, %41 : vector<8x1xf32>
    %44 = arith.divf %42, %43 : vector<8x1xf32>
    %c0_26 = arith.constant 0 : index
    %c0_27 = arith.constant 0 : index
    %45 = vector.load %arg10[%c0_26, %c0_27] : memref<8x2xf32, #tpu.memory_space<vmem>>, vector<8x1xf32>
    tpu.vector_store %arg10[%c0_26, %c0_27], %44 {strides = array<i32>} : memref<8x2xf32, #tpu.memory_space<vmem>>, vector<8x1xf32>,
    %cst_28 = arith.constant 1.000000e+00 : f32
    %46 = vector.broadcast %cst_28 : f32 to vector<8x1xf32>
    %47 = arith.subf %46, %44 : vector<8x1xf32>
    %c0_29 = arith.constant 0 : index
    %c1 = arith.constant 1 : index
    %48 = vector.load %arg10[%c0_29, %c1] : memref<8x2xf32, #tpu.memory_space<vmem>>, vector<8x1xf32>
    tpu.vector_store %arg10[%c0_29, %c1], %47 {strides = array<i32>} : memref<8x2xf32, #tpu.memory_space<vmem>>, vector<8x1xf32>,
    return
  }
  func.func @transform_0(%arg0: i32) -> (i32, i32) {
    %c0_i32 = arith.constant 0 : i32
    %c0_i32_0 = arith.constant 0 : i32
    return %arg0, %c0_i32 : i32, i32
  }
  func.func @transform_1(%arg0: i32) -> (i32, i32) {
    %c0_i32 = arith.constant 0 : i32
    %c0_i32_0 = arith.constant 0 : i32
    %c0_i32_1 = arith.constant 0 : i32
    return %c0_i32, %c0_i32_0 : i32, i32
  }
  func.func @transform_2(%arg0: i32) -> (i32, i32) {
    %c0_i32 = arith.constant 0 : i32
    %c0_i32_0 = arith.constant 0 : i32
    %c0_i32_1 = arith.constant 0 : i32
    return %c0_i32, %c0_i32_0 : i32, i32
  }
  func.func @transform_3(%arg0: i32) -> (i32, i32) {
    %c0_i32 = arith.constant 0 : i32
    %c0_i32_0 = arith.constant 0 : i32
    %c0_i32_1 = arith.constant 0 : i32
    return %c0_i32, %c0_i32_0 : i32, i32
  }
  func.func @transform_4(%arg0: i32) -> (i32, i32) {
    %c0_i32 = arith.constant 0 : i32
    %c0_i32_0 = arith.constant 0 : i32
    %c0_i32_1 = arith.constant 0 : i32
    return %c0_i32, %c0_i32_0 : i32, i32
  }
  func.func @transform_5(%arg0: i32) -> (i32, i32) {
    %c0_i32 = arith.constant 0 : i32
    %c0_i32_0 = arith.constant 0 : i32
    %c0_i32_1 = arith.constant 0 : i32
    return %c0_i32, %c0_i32_0 : i32, i32
  }
  func.func @transform_6(%arg0: i32) -> (i32, i32) {
    %c0_i32 = arith.constant 0 : i32
    %c0_i32_0 = arith.constant 0 : i32
    %c0_i32_1 = arith.constant 0 : i32
    return %c0_i32, %c0_i32_0 : i32, i32
  }
  func.func @transform_7(%arg0: i32) -> (i32, i32) {
    %c0_i32 = arith.constant 0 : i32
    %c0_i32_0 = arith.constant 0 : i32
    %c0_i32_1 = arith.constant 0 : i32
    return %c0_i32, %c0_i32_0 : i32, i32
  }
  func.func @transform_8(%arg0: i32) -> (i32, i32) {
    %c0_i32 = arith.constant 0 : i32
    %c0_i32_0 = arith.constant 0 : i32
    %c0_i32_1 = arith.constant 0 : i32
    return %c0_i32, %c0_i32_0 : i32, i32
  }
  func.func @transform_9(%arg0: i32) -> (i32, i32) {
    %c0_i32 = arith.constant 0 : i32
    %c0_i32_0 = arith.constant 0 : i32
    return %arg0, %c0_i32 : i32, i32
  }
}

</mosaic_0001>

<bundles_post_ra>
// kernel: tpu_custom_call.1
= control target key start
LH: loop header
LB: loop body
LE: loop exit
PB: predicated region body
PF: predicated region fallthrough
CT: control target
= control target key end

     0   :  { %v525_v0 = vmov 0.0|0.0   ;;  %vm526_vm0 = vmmov 0   ;;  %v527_v4 = vmov 0.0   ;;  %vm48_vm1 = vcmask 523264   ;;  %s529_s15 = smov 1   ;;  %s721_s1 = inlined_call_operand.vmem [shape: f32[64,128], index: 1, kind: input, shape index: {}]   ;;  %s722_s3 = inlined_call_operand.vmem [shape: f32[128,64], index: 3, kind: input, shape index: {}]   ;;  %s723_s0 = inlined_call_operand.vmem [shape: f32[8,64], index: 0, kind: input, shape index: {}]   ;;  %s724_s6 = inlined_call_operand.vmem [shape: f32[64,2], index: 6, kind: input, shape index: {}]   ;;  %s725_s2 = inlined_call_operand.vmem [shape: f32[1,128], index: 2, kind: input, shape index: {}]   ;;  %s726_s4 = inlined_call_operand.vmem [shape: f32[1,64], index: 4, kind: input, shape index: {}]   ;;  %s727_s5 = inlined_call_operand.vmem [shape: f32[1,64], index: 5, kind: input, shape index: {}]   ;;  %s728_s7 = inlined_call_operand.vmem [shape: f32[1,2], index: 7, kind: input, shape index: {}]   ;;  %s729_s8 = inlined_call_operand.vmem [shape: f32[1,2], index: 8, kind: input, shape index: {}]   ;;  %s730_s9 = inlined_call_operand.vmem [shape: f32[8,2], index: 9, kind: output, shape index: {}]  }
   0x1   :  { %468 = vmatprep.subr.bf16.mxu0 %v525_v0  ;;  %v33_v1 = vld [vmem:[%s721_s1] sm:$0xff]  ;;  %v34_v2 = vld [vmem:[%s721_s1 + $0x8] sm:$0xff]  ;;  %v35_v3 = vld [vmem:[%s721_s1 + $0x10] sm:$0xff]  ;;  %411 = vmatprep.mubr.msk.f32.mxu0 %vm526_vm0, %v527_v4  ;;  %vm339_vm5 = vcmask 7168   ;;  %vm346_vm6 = vcmask 15368  }
   0x2   :  { %v469_v5 = vpack.c.bf16 %v34_v2, %v33_v1  ;;  %v36_v6 = vld [vmem:[%s721_s1 + $0x18] sm:$0xff]  ;;  %480 = vmatprep.subr.bf16.mxu1 %v525_v0  ;;  %446 = vmatprep.mubr.msk.f32.mxu1 %vm526_vm0, %v527_v4  ;;  %v125_v8 = vld [vmem:[%s722_s3] sm:$0xff]  ;;  %v126_v9 = vld [vmem:[%s722_s3 + $0x8] sm:$0xff] }
   0x3   :  { %v472_v7 = vpack.c.bf16 %v36_v6, %v35_v3  ;;  %v127_v10 = vld [vmem:[%s722_s3 + $0x10] sm:$0xff]  ;;  %v37_v11 = vld [vmem:[%s721_s1 + $0x20] sm:$0xff]  ;;  %v38_v12 = vld [vmem:[%s721_s1 + $0x28] sm:$0xff]  ;;  %v481_v13 = vpack.c.bf16 %v126_v9, %v125_v8 }
   0x4   :  { %470 = vmatpush3.bf16.msra.mxu0 %v469_v5  ;;  %v128_v14 = vld [vmem:[%s722_s3 + $0x18] sm:$0xff]  ;;  %v475_v16 = vpack.c.bf16 %v38_v12, %v37_v11  ;;  %v129_v17 = vld [vmem:[%s722_s3 + $0x20] sm:$0xff]  ;;  %v130_v18 = vld [vmem:[%s722_s3 + $0x28] sm:$0xff] }
   0x5   :  { %471 = vmatprep.subr.bf16.mxu0 %v525_v0  ;;  %482 = vmatpush3.bf16.msra.mxu1 %v481_v13  ;;  %v484_v15 = vpack.c.bf16 %v128_v14, %v127_v10  ;;  %v39_v19 = vld [vmem:[%s721_s1 + $0x30] sm:$0xff]  ;;  %v40_v20 = vld [vmem:[%s721_s1 + $0x38] sm:$0xff]  ;;  %v487_v21 = vpack.c.bf16 %v130_v18, %v129_v17  ;;  %v32_v26 = vld [vmem:[%s723_s0] sm:$0xff] }
   0x6   :  { %483 = vmatprep.subr.bf16.mxu1 %v525_v0  ;;  %v478_v22 = vpack.c.bf16 %v40_v20, %v39_v19  ;;  %v131_v23 = vld [vmem:[%s722_s3 + $0x30] sm:$0xff]  ;;  %v132_v24 = vld [vmem:[%s722_s3 + $0x38] sm:$0xff]  ;;  %v133_v27 = vld [vmem:[%s722_s3 + $0x40] sm:$0xff] }
   0x7   :  { %v490_v25 = vpack.c.bf16 %v132_v24, %v131_v23  ;;  %v134_v28 = vld [vmem:[%s722_s3 + $0x48] sm:$0xff]  ;;  %v135_v30 = vld [vmem:[%s722_s3 + $0x50] sm:$0xff]  ;;  %v136_v31 = vld [vmem:[%s722_s3 + $0x58] sm:$0xff] }
   0x8   :  { %473 = vmatpush3.bf16.msra.mxu0 %v472_v7  ;;  %v493_v29 = vpack.c.bf16 %v134_v28, %v133_v27  ;;  %v496_v32 = vpack.c.bf16 %v136_v31, %v135_v30  ;;  %v137_v33 = vld [vmem:[%s722_s3 + $0x60] sm:$0xff]  ;;  %v138_v34 = vld [vmem:[%s722_s3 + $0x68] sm:$0xff]  ;;  %v139_v36 = vld [vmem:[%s722_s3 + $0x70] sm:$0xff] }
   0x9   :  { %474 = vmatprep.subr.bf16.mxu0 %v525_v0  ;;  %485 = vmatpush3.bf16.msra.mxu1 %v484_v15  ;;  %v499_v35 = vpack.c.bf16 %v138_v34, %v137_v33  ;;  %v140_v37 = vld [vmem:[%s722_s3 + $0x78] sm:$0xff]  ;;  %v229_v39 = vld [vmem:[%s724_s6] sm:$0xff]  ;;  %v230_v40 = vld [vmem:[%s724_s6 + $0x8] sm:$0xff] }
   0xa   :  { %486 = vmatprep.subr.bf16.mxu1 %v525_v0  ;;  %v502_v38 = vpack.c.bf16 %v140_v37, %v139_v36  ;;  %v231_v41 = vld [vmem:[%s724_s6 + $0x10] sm:$0xff]  ;;  %v505_v42 = vpack.c.bf16 %v230_v40, %v229_v39  ;;  %v232_v43 = vld [vmem:[%s724_s6 + $0x18] sm:$0xff]  ;;  %v352_v45 = vld [vmem:[%s725_s2] ss:$0 sm:$0xff] }
   0xb   :  { %v508_v44 = vpack.c.bf16 %v232_v43, %v231_v41  ;;  %v233_v51 = vld [vmem:[%s724_s6 + $0x20] sm:$0xff]  ;;  %v234_v52 = vld [vmem:[%s724_s6 + $0x28] sm:$0xff]  ;;  %v235_v54 = vld [vmem:[%s724_s6 + $0x30] sm:$0xff] }
   0xc   :  { %476 = vmatpush3.bf16.msra.mxu0 %v475_v16  ;;  %v511_v53 = vpack.c.bf16 %v234_v52, %v233_v51  ;;  %v236_v55 = vld [vmem:[%s724_s6 + $0x38] sm:$0xff]  ;;  %v354_v57 = vld [vmem:[%s726_s4] ss:$0 sm:$0xff] }
   0xd   :  { %477 = vmatprep.subr.bf16.mxu0 %v525_v0  ;;  %488 = vmatpush3.bf16.msra.mxu1 %v487_v21  ;;  %v514_v56 = vpack.c.bf16 %v236_v55, %v235_v54  ;;  %v355_v62 = vld [vmem:[%s727_s5] ss:$0 sm:$0xff]  ;;  %s528_s5 = smov 127  }
   0xe   :  { %489 = vmatprep.subr.bf16.mxu1 %v525_v0  ;;  %v356_v1 = vld [vmem:[%s728_s7] ss:$0 sm:$0xff] }
   0xf   :  { %v358_v6 = vld [vmem:[%s729_s8] ss:$0 sm:$0xff] }
  0x10   :  { %479 = vmatpush3.bf16.msra.mxu0 %v478_v22 }
  0x11   :  { %504 = vmatprep.subr.bf16.mxu0 %v525_v0  ;;  %491 = vmatpush3.bf16.msra.mxu1 %v490_v25 }
  0x12   :  { %492 = vmatprep.subr.bf16.mxu1 %v525_v0 }
  0x13   :  { %412 = vmatmul.mubr.msk.f32.vlgmr.msra.gmra.mrb[0].mxu0 %vm48_vm1, %v32_v26 }
  0x14   :  { %465 = vmatprep.mubr.msk.f32.mxu0 %vm526_vm0, %v527_v4  ;;  %506 = vmatpush3.bf16.msra.mxu0 %v505_v42 }
  0x15   :  { %494 = vmatpush3.bf16.msra.mxu1 %v493_v29  ;;  %507 = vmatprep.subr.bf16.mxu0 %v525_v0 }
  0x16   :  { %495 = vmatprep.subr.bf16.mxu1 %v525_v0 }
  0x18   :  { %509 = vmatpush3.bf16.msra.mxu0 %v508_v44 }
  0x19   :  { %497 = vmatpush3.bf16.msra.mxu1 %v496_v32  ;;  %510 = vmatprep.subr.bf16.mxu0 %v525_v0 }
  0x1a   :  { %498 = vmatprep.subr.bf16.mxu1 %v525_v0 }
  0x1c   :  { %512 = vmatpush3.bf16.msra.mxu0 %v511_v53 }
  0x1d   :  { %500 = vmatpush3.bf16.msra.mxu1 %v499_v35  ;;  %513 = vmatprep.subr.bf16.mxu0 %v525_v0 }
  0x1e   :  { %501 = vmatprep.subr.bf16.mxu1 %v525_v0 }
  0x20   :  { %515 = vmatpush3.bf16.msra.mxu0 %v514_v56 }
  0x21   :  { %503 = vmatpush3.bf16.msra.mxu1 %v502_v38 }
  0xe6   :  { %v118_v46 = vpop.f32.mrb[0].mxu0 }
  0xe7   :  { %v119_v47 = vadd.f32 %v352_v45, %v118_v46  ;;  %v413_v48 = vpop.f32.mrb[1].mxu0 }
  0xe9   :  { %v123_v49 = vmul.f32 0.01, %v119_v47  ;;  %vm122_vm2 = vcmp.ge.f32.partialorder %v119_v47, 0.0 }
  0xeb   :  { %v124_v50 = vsel %vm122_vm2, %v119_v47, %v123_v49 }
  0xec   :  { %447 = vmatmul.mubr.f32.vlgmr.msra.gmra.mrb[0].mxu1 %v124_v50 }
 0x1bf   :  { %v214_v58 = vpop.f32.mrb[0].mxu1 }
 0x1c0   :  { %v215_v59 = vadd.f32 %v354_v57, %v214_v58  ;;  %v448_v60 = vpop.f32.mrb[1].mxu1 }
 0x1c2   :  { %vm218_vm3 = vcmp.ge.f32.partialorder %v215_v59, 0.0  ;;  %v219_v61 = vmul.f32 0.01, %v215_v59 }
 0x1c4   :  { %v220_v63 = vsel %vm218_vm3, %v215_v59, %v219_v61 }
 0x1c5   :  { %v228_v0 = vadd.f32 %v355_v62, %v220_v63 }
 0x1c7   :  { %466 = vmatmul.mubr.msk.f32.vlgmr.msra.gmra.mrb[2].mxu0 %vm48_vm1, %v228_v0 }
 0x29a   :  { %v313_v2 = vpop.f32.mrb[2].mxu0 }
 0x29b   :  { %v314_v3 = vadd.f32 %v356_v1, %v313_v2  ;;  %v467_v4 = vpop.f32.mrb[3].mxu0 }
 0x29d   :  { %v318_v5 = vmul.f32 0.01, %v314_v3  ;;  %vm317_vm4 = vcmp.ge.f32.partialorder %v314_v3, 0.0 }
 0x29f   :  { %v319_v7 = vsel %vm317_vm4, %v314_v3, %v318_v5 }
 0x2a0   :  { %v327_v8 = vadd.f32 %v358_v6, %v319_v7 }
 0x2a2   :  { %329 = vrot.lane.b32.xlu0 %v327_v8, %s528_s5 }
 0x314   :  { %v330_v9 = vpop.permute.xlu0 %329 }
 0x315   :  { %v332_v10 = vsub.f32 %v327_v8, %v330_v9 }
 0x317   :  { %v359_v11 = vmul.f32 -1.442695, %v332_v10 }
 0x319   :  { %521 = vpow2.f32 %v359_v11 }
 0x323   :  { %v522_v12 = vpop.eup %521 }
 0x324   :  { %v336_v13 = vadd.f32 1.0, %v522_v12 }
 0x326   :  { %523 = vrcp.f32 %v336_v13 }
 0x330   :  { %v524_v14 = vpop.eup %523 }
 0x331   :  { %v341_v15 = vsub.f32 1.0, %v524_v14  ;;  %340 = vst.msk [vmem:[%s730_s9] sm:$0xff] %vm339_vm5, %v524_v14 }
 0x333   :  { %343 = vrot.lane.b32.xlu0 %v341_v15, %s529_s15 }
 0x3a5   :  { %v344_v16 = vpop.permute.xlu0 %343 }
 0x3a6   :  { %347 = vst.msk [vmem:[%s730_s9] sm:$0xff] %vm346_vm6, %v344_v16 }

</bundles_post_ra>
